<compile_context>
chip_gen: v6e
topology: v6e:2x2x1
jax: 0.10.0
libtpu: 0.0.40
codegen_flags: <defaults>
</compile_context>

<pallas_src>
import functools

import jax
import jax.numpy as jnp
from jax.experimental import pallas as pl
from jax.experimental.pallas import tpu as pltpu


def _label_smoothing_kernel(x_ref, t_ref, out_ref, acc_ref, *,
                            confidence, smoothing, true_n, tile_n,
                            tiles_per_core):
    p = pl.program_id(0)          # core-parallel axis
    t = pl.program_id(1)          # serial reduction axis (tiles for this core)

    @pl.when(t == 0)
    def _init():
        acc_ref[...] = jnp.zeros_like(acc_ref)

    x = x_ref[...].astype(jnp.float32)           # (tile_n, C)
    tgt = t_ref[...]                             # (tile_n, 1) int32
    c = x.shape[-1]

    # Numerically-stable per-row log-sum-exp.
    m = jnp.max(x, axis=-1, keepdims=True)                                  # (tile_n, 1)
    lse = jnp.log(jnp.sum(jnp.exp(x - m), axis=-1, keepdims=True)) + m      # (tile_n, 1)

    # Fused target-gather + mean: a single weighted row reduction.
    #   loss = lse - conf*x[i,tgt] - (smooth/C)*sum_c x[i,c]
    col = jax.lax.broadcasted_iota(jnp.int32, x.shape, dimension=1)
    w_other = smoothing / c
    w_target = confidence + w_other
    w = jnp.where(col == tgt, jnp.float32(w_target), jnp.float32(w_other))
    term = jnp.sum(x * w, axis=-1, keepdims=True)                           # (tile_n, 1)
    loss = lse - term                                                       # (tile_n, 1)

    tile_start = (p * tiles_per_core + t) * tile_n
    needs_mask = tile_start + tile_n > true_n     # ragged / clamped duplicate tile

    @pl.when(needs_mask)
    def _accumulate_masked():
        row = tile_start + jax.lax.broadcasted_iota(jnp.int32, loss.shape, 0)
        acc_ref[...] += jnp.sum(jnp.where(row < true_n, loss, 0.0))

    @pl.when(jnp.logical_not(needs_mask))
    def _accumulate_full():
        acc_ref[...] += jnp.sum(loss)

    @pl.when(t == pl.num_programs(1) - 1)
    def _finalize():
        out_ref[0, 0] = jnp.sum(acc_ref[...])     # per-core partial sum


def label_smoothing_loss(x, target, smoothing=0.1, max_tile_rows=None):
    """x: (N, C) float logits (f32 or bf16), target: (N,) int class indices. Returns scalar."""
    confidence = 1.0 - smoothing
    n, c = x.shape

    # Row-tile sizing: sublane-aligned for the dtype, bounded by VMEM bytes.
    # Account for the 128-lane padding of both the x tile and the int32 target
    # tile in VMEM (target column pads 1 -> 128 lanes).
    itemsize = jnp.dtype(x.dtype).itemsize
    row_align = 8 * max(1, 4 // itemsize)             # f32 -> 8, bf16 -> 16
    c_pad = pl.cdiv(c, 128) * 128
    x_row_vmem = c_pad * itemsize                     # VMEM bytes per x row
    tgt_row_vmem = 128 * 4                            # VMEM bytes per target row
    x_tile_cap = 4 * 1024 * 1024                      # per x buffer (v7x-safe)
    pair_cap = 8 * 1024 * 1024                        # per (x + target) buffer pair
    tile_n = min(x_tile_cap // x_row_vmem, pair_cap // (x_row_vmem + tgt_row_vmem))
    if max_tile_rows is not None:
        tile_n = min(tile_n, max_tile_rows)
    tile_n = (tile_n // row_align) * row_align
    tile_n = max(row_align, min(tile_n, pl.cdiv(n, row_align) * row_align))

    # No padding of x/target: ragged last block + in-kernel row mask handle the tail.
    n_tiles = pl.cdiv(n, tile_n)
    num_cores = 2 if n_tiles >= 2 else 1              # v7x megacore split; harmless elsewhere
    tiles_per_core = pl.cdiv(n_tiles, num_cores)

    t2d = target.astype(jnp.int32).reshape(n, 1)

    def row_block_index(p, t):
        # Clamp so out-of-range (duplicate) tiles stay in bounds; their rows are
        # >= n and get masked to zero inside the kernel.
        return (jnp.minimum(p * tiles_per_core + t, n_tiles - 1), 0)

    kernel = functools.partial(
        _label_smoothing_kernel,
        confidence=confidence, smoothing=smoothing, true_n=n,
        tile_n=tile_n, tiles_per_core=tiles_per_core)

    partial_sums = pl.pallas_call(
        kernel,
        out_shape=jax.ShapeDtypeStruct((num_cores, 1), jnp.float32),
        grid=(num_cores, tiles_per_core),
        in_specs=[
            pl.BlockSpec((tile_n, c), row_block_index),
            pl.BlockSpec((tile_n, 1), row_block_index),
        ],
        out_specs=pl.BlockSpec((1, 1), lambda p, t: (p, 0),
                               memory_space=pltpu.MemorySpace.SMEM),
        scratch_shapes=[pltpu.VMEM((1, 1), jnp.float32)],
        compiler_params=pltpu.CompilerParams(
            dimension_semantics=("parallel", "arbitrary"),
            vmem_limit_bytes=32 * 1024 * 1024),
    )(x, t2d)

    return jnp.sum(partial_sums) / jnp.float32(n)


def _reference(x, target, smoothing=0.1):
    confidence = 1.0 - smoothing
    logprobs = jax.nn.log_softmax(x.astype(jnp.float32), axis=-1)
    nll = -jnp.take_along_axis(logprobs, target[:, None].astype(jnp.int32), axis=-1)[:, 0]
    smooth = -jnp.mean(logprobs, axis=-1)
    return jnp.mean(confidence * nll + smoothing * smooth)


if __name__ == "__main__":
    key = jax.random.PRNGKey(0)
    kx, kt, kx2, kt2, kx3, kt3 = jax.random.split(key, 6)

    # 1) f32 logits; batch not sublane-aligned -> exercises the ragged last block
    #    + in-kernel row masking (no wrapper-side padding of x).
    N, C = 13, 40
    x = jax.random.normal(kx, (N, C), dtype=jnp.float32)
    target = jax.random.randint(kt, (N,), 0, C, dtype=jnp.int32)
    loss = label_smoothing_loss(x, target, smoothing=0.1)
    jax.block_until_ready(loss)
    ref = _reference(x, target, smoothing=0.1)
    assert jnp.allclose(loss, ref, atol=1e-5, rtol=1e-5), (loss, ref)

    # 2) bf16 logits (no wrapper-side cast; in-kernel f32 math).
    N2, C2 = 16, 32
    x2 = jax.random.normal(kx2, (N2, C2), dtype=jnp.float32)
    t2 = jax.random.randint(kt2, (N2,), 0, C2, dtype=jnp.int32)
    x2_bf = x2.astype(jnp.bfloat16)
    loss_bf = label_smoothing_loss(x2_bf, t2, smoothing=0.1)
    jax.block_until_ready(loss_bf)
    ref_bf = _reference(x2_bf.astype(jnp.float32), t2, smoothing=0.1)
    assert jnp.allclose(loss_bf, ref_bf, atol=1e-4, rtol=1e-4), (loss_bf, ref_bf)

    # 3) Force tiny tiles -> exercises the 2-axis (parallel, arbitrary) grid,
    #    multi-tile accumulation, the clamped duplicate tile, and the ragged tail.
    N3, C3 = 53, 40
    x3 = jax.random.normal(kx3, (N3, C3), dtype=jnp.float32)
    t3 = jax.random.randint(kt3, (N3,), 0, C3, dtype=jnp.int32)
    loss3 = label_smoothing_loss(x3, t3, smoothing=0.2, max_tile_rows=8)
    jax.block_until_ready(loss3)
    ref3 = _reference(x3, t3, smoothing=0.2)
    assert jnp.allclose(loss3, ref3, atol=1e-5, rtol=1e-5), (loss3, ref3)

    print("KERNEL_OK")
</pallas_src>

<mosaic_0001>
module attributes {stable_mosaic.version = 11 : i64} {
  func.func @_label_smoothing_kernel(%arg0: i32, %arg1: i32, %arg2: memref<16x40xf32, #tpu.memory_space<vmem>>, %arg3: memref<16x1xi32, #tpu.memory_space<vmem>>, %arg4: memref<1x1xf32, #tpu.memory_space<smem>>, %arg5: memref<1x1xf32, #tpu.memory_space<vmem>>) attributes {dimension_semantics = [#tpu.dimension_semantics<parallel>, #tpu.dimension_semantics<arbitrary>], iteration_bounds = array<i64: 1, 1>, scalar_prefetch = 0 : i64, scratch_operands = 1 : i64, tpu.core_type = #tpu.core_type<tc>, window_params = [{transform_indices = @transform_0, window_bounds = array<i64: 16, 40>}, {transform_indices = @transform_1, window_bounds = array<i64: 16, 1>}, {transform_indices = @transform_2, window_bounds = array<i64: 1, 1>}]} {
    %c0_i32 = arith.constant 0 : i32
    %0 = arith.cmpi eq, %arg1, %c0_i32 : i32
    %1 = arith.extui %0 : i1 to i32
    %c0_i32_0 = arith.constant 0 : i32
    %2 = arith.cmpi ne, %1, %c0_i32_0 : i32
    scf.if %2 {
      %cst_13 = arith.constant 0.000000e+00 : f32
      %37 = vector.broadcast %cst_13 : f32 to vector<1x1xf32>
      %c0_14 = arith.constant 0 : index
      %c0_15 = arith.constant 0 : index
      %38 = vector.load %arg5[%c0_14, %c0_15] : memref<1x1xf32, #tpu.memory_space<vmem>>, vector<1x1xf32>
      tpu.vector_store %arg5[%c0_14, %c0_15], %37 {strides = array<i32>} : memref<1x1xf32, #tpu.memory_space<vmem>>, vector<1x1xf32>,
    } else {
    }
    %c0 = arith.constant 0 : index
    %c0_1 = arith.constant 0 : index
    %3 = vector.load %arg2[%c0, %c0_1] : memref<16x40xf32, #tpu.memory_space<vmem>>, vector<16x40xf32>
    %c0_2 = arith.constant 0 : index
    %c0_3 = arith.constant 0 : index
    %4 = vector.load %arg3[%c0_2, %c0_3] : memref<16x1xi32, #tpu.memory_space<vmem>>, vector<16x1xi32>
    %cst = arith.constant dense<0xFF800000> : vector<16xf32>
    %5 = vector.multi_reduction <maximumf>, %3, %cst [1] : vector<16x40xf32> to vector<16xf32>
    %6 = vector.shape_cast %5 : vector<16xf32> to vector<16x1xf32>
    %7 = vector.broadcast %6 : vector<16x1xf32> to vector<16x40xf32>
    %8 = arith.subf %3, %7 : vector<16x40xf32>
    %9 = math.exp %8 : vector<16x40xf32>
    %cst_4 = arith.constant dense<0.000000e+00> : vector<16xf32>
    %10 = vector.multi_reduction <add>, %9, %cst_4 [1] : vector<16x40xf32> to vector<16xf32>
    %11 = vector.shape_cast %10 : vector<16xf32> to vector<16x1xf32>
    %12 = math.log %11 : vector<16x1xf32>
    %13 = arith.addf %12, %6 : vector<16x1xf32>
    %14 = tpu.iota {dimensions = array<i32: 1>} : vector<16x40xi32>
    %15 = vector.broadcast %4 : vector<16x1xi32> to vector<16x40xi32>
    %16 = arith.cmpi eq, %14, %15 : vector<16x40xi32>
    %cst_5 = arith.constant 0.902499973 : f32
    %cst_6 = arith.constant 2.500000e-03 : f32
    %17 = vector.broadcast %cst_5 : f32 to vector<16x40xf32>
    %18 = vector.broadcast %cst_6 : f32 to vector<16x40xf32>
    %19 = arith.select %16, %17, %18 : vector<16x40xi1>, vector<16x40xf32>
    %20 = arith.mulf %3, %19 : vector<16x40xf32>
    %cst_7 = arith.constant dense<0.000000e+00> : vector<16xf32>
    %21 = vector.multi_reduction <add>, %20, %cst_7 [1] : vector<16x40xf32> to vector<16xf32>
    %22 = vector.shape_cast %21 : vector<16xf32> to vector<16x1xf32>
    %23 = arith.subf %13, %22 : vector<16x1xf32>
    %c1_i32 = arith.constant 1 : i32
    %24 = arith.muli %arg0, %c1_i32 : i32
    %25 = arith.addi %24, %arg1 : i32
    %c16_i32 = arith.constant 16 : i32
    %26 = arith.muli %25, %c16_i32 : i32
    %c16_i32_8 = arith.constant 16 : i32
    %27 = arith.addi %26, %c16_i32_8 : i32
    %c13_i32 = arith.constant 13 : i32
    %28 = arith.cmpi sgt, %27, %c13_i32 : i32
    %29 = arith.extui %28 : i1 to i32
    %c0_i32_9 = arith.constant 0 : i32
    %30 = arith.cmpi ne, %29, %c0_i32_9 : i32
    scf.if %30 {
      %37 = tpu.iota {dimensions = array<i32: 0>} : vector<16x1xi32>
      %38 = vector.broadcast %26 : i32 to vector<16x1xi32>
      %39 = arith.addi %38, %37 : vector<16x1xi32>
      %c0_13 = arith.constant 0 : index
      %c0_14 = arith.constant 0 : index
      %40 = vector.load %arg5[%c0_13, %c0_14] : memref<1x1xf32, #tpu.memory_space<vmem>>, vector<1x1xf32>
      %c13_i32_15 = arith.constant 13 : i32
      %41 = vector.broadcast %c13_i32_15 : i32 to vector<16x1xi32>
      %42 = arith.cmpi slt, %39, %41 : vector<16x1xi32>
      %cst_16 = arith.constant 0.000000e+00 : f32
      %43 = vector.broadcast %cst_16 : f32 to vector<16x1xf32>
      %44 = arith.select %42, %23, %43 : vector<16x1xi1>, vector<16x1xf32>
      %45 = vector.shape_cast %44 : vector<16x1xf32> to vector<1x16x1xf32>
      %cst_17 = arith.constant dense<0.000000e+00> : vector<1xf32>
      %46 = vector.multi_reduction <add>, %45, %cst_17 [1, 2] : vector<1x16x1xf32> to vector<1xf32>
      %47 = vector.shape_cast %46 : vector<1xf32> to vector<1x1x1xf32>
      %48 = vector.extract %47[0, 0, 0] : f32 from vector<1x1x1xf32>
      %49 = vector.broadcast %48 : f32 to vector<1x1xf32>
      %50 = arith.addf %40, %49 : vector<1x1xf32>
      %c0_18 = arith.constant 0 : index
      %c0_19 = arith.constant 0 : index
      %51 = vector.load %arg5[%c0_18, %c0_19] : memref<1x1xf32, #tpu.memory_space<vmem>>, vector<1x1xf32>
      tpu.vector_store %arg5[%c0_18, %c0_19], %50 {strides = array<i32>} : memref<1x1xf32, #tpu.memory_space<vmem>>, vector<1x1xf32>,
    } else {
    }
    %true = arith.constant true
    %31 = arith.xori %28, %true : i1
    %32 = arith.extui %31 : i1 to i32
    %c0_i32_10 = arith.constant 0 : i32
    %33 = arith.cmpi ne, %32, %c0_i32_10 : i32
    scf.if %33 {
      %c0_13 = arith.constant 0 : index
      %c0_14 = arith.constant 0 : index
      %37 = vector.load %arg5[%c0_13, %c0_14] : memref<1x1xf32, #tpu.memory_space<vmem>>, vector<1x1xf32>
      %38 = vector.shape_cast %23 : vector<16x1xf32> to vector<1x16x1xf32>
      %cst_15 = arith.constant dense<0.000000e+00> : vector<1xf32>
      %39 = vector.multi_reduction <add>, %38, %cst_15 [1, 2] : vector<1x16x1xf32> to vector<1xf32>
      %40 = vector.shape_cast %39 : vector<1xf32> to vector<1x1x1xf32>
      %41 = vector.extract %40[0, 0, 0] : f32 from vector<1x1x1xf32>
      %42 = vector.broadcast %41 : f32 to vector<1x1xf32>
      %43 = arith.addf %37, %42 : vector<1x1xf32>
      %c0_16 = arith.constant 0 : index
      %c0_17 = arith.constant 0 : index
      %44 = vector.load %arg5[%c0_16, %c0_17] : memref<1x1xf32, #tpu.memory_space<vmem>>, vector<1x1xf32>
      tpu.vector_store %arg5[%c0_16, %c0_17], %43 {strides = array<i32>} : memref<1x1xf32, #tpu.memory_space<vmem>>, vector<1x1xf32>,
    } else {
    }
    %c0_i32_11 = arith.constant 0 : i32
    %34 = arith.cmpi eq, %arg1, %c0_i32_11 : i32
    %35 = arith.extui %34 : i1 to i32
    %c0_i32_12 = arith.constant 0 : i32
    %36 = arith.cmpi ne, %35, %c0_i32_12 : i32
    scf.if %36 {
      %c0_13 = arith.constant 0 : index
      %c0_14 = arith.constant 0 : index
      %37 = vector.load %arg5[%c0_13, %c0_14] : memref<1x1xf32, #tpu.memory_space<vmem>>, vector<1x1xf32>
      %38 = vector.shape_cast %37 : vector<1x1xf32> to vector<1x1x1xf32>
      %cst_15 = arith.constant dense<0.000000e+00> : vector<1xf32>
      %39 = vector.multi_reduction <add>, %38, %cst_15 [1, 2] : vector<1x1x1xf32> to vector<1xf32>
      %40 = vector.shape_cast %39 : vector<1xf32> to vector<1x1x1xf32>
      %41 = vector.extract %40[0, 0, 0] : f32 from vector<1x1x1xf32>
      %c0_16 = arith.constant 0 : index
      %c0_17 = arith.constant 0 : index
      %42 = memref.load %arg4[%c0_16, %c0_17] : memref<1x1xf32, #tpu.memory_space<smem>>
      memref.store %41, %arg4[%c0_16, %c0_17] : memref<1x1xf32, #tpu.memory_space<smem>>
    } else {
    }
    return
  }
  func.func @transform_0(%arg0: i32, %arg1: i32) -> (i32, i32) {
    %c1_i32 = arith.constant 1 : i32
    %0 = arith.muli %arg0, %c1_i32 : i32
    %1 = arith.addi %0, %arg1 : i32
    %c0_i32 = arith.constant 0 : i32
    %2 = arith.minsi %1, %c0_i32 : i32
    %c0_i32_0 = arith.constant 0 : i32
    %c0_i32_1 = arith.constant 0 : i32
    return %2, %c0_i32_0 : i32, i32
  }
  func.func @transform_1(%arg0: i32, %arg1: i32) -> (i32, i32) {
    %c1_i32 = arith.constant 1 : i32
    %0 = arith.muli %arg0, %c1_i32 : i32
    %1 = arith.addi %0, %arg1 : i32
    %c0_i32 = arith.constant 0 : i32
    %2 = arith.minsi %1, %c0_i32 : i32
    %c0_i32_0 = arith.constant 0 : i32
    %c0_i32_1 = arith.constant 0 : i32
    return %2, %c0_i32_0 : i32, i32
  }
  func.func @transform_2(%arg0: i32, %arg1: i32) -> (i32, i32) {
    %c0_i32 = arith.constant 0 : i32
    %c0_i32_0 = arith.constant 0 : i32
    return %arg0, %c0_i32 : i32, i32
  }
}

</mosaic_0001>

<bundles_post_ra>
// kernel: tpu_custom_call.1
= control target key start
LH: loop header
LB: loop body
LE: loop exit
PB: predicated region body
PF: predicated region fallthrough
CT: control target
= control target key end

     0   :  { %vm86_vm0 = vcmask 326656   ;;  %v251_v4 = vmov 0   ;;  %s291_s0 = inlined_call_operand.vmem [shape: f32[13,40], index: 0, kind: input, shape index: {}]   ;;  %s292_s1 = inlined_call_operand.vmem [shape: s32[13,1], index: 1, kind: input, shape index: {}]   ;;  %s293_s2 = inlined_call_operand.hbm [shape: f32[1,1], index: 2, kind: output, shape index: {}]  }
   0x1   :  { %v83_v0 = vld [vmem:[%s291_s0 + $0x8] sm:$0xff]  ;;  %v82_v1 = vld [vmem:[%s291_s0] sm:$0xff]  ;;  %231 = vset.pattern.permute.xlu1 %v251_v4  ;;  %232 = vset.pattern.permute.xlu0 %v251_v4 }
   0x2   :  { %v85_v2 = vld [vmem:[%s292_s1 + $0x8] sm:$0xff]  ;;  %v90_v3 = vsel %vm86_vm0, %v83_v0, -inf }
   0x3   :  { %7 = vsyncpa [#allocation4], 0  ;;  %91 = vmax.xlane.f32.xlu0 %v90_v3  ;;  %117 = vperm.xlu1 %231, %v85_v2   ;;  %v87_v5 = vsel %vm86_vm0, %v82_v1, -inf  ;;  %v84_v6 = vld [vmem:[%s292_s1] sm:$0xff]  ;;  %v111_v10 = vlaneseq  ;;  %v252_v17 = vmov 0.0025  }
   0x4   :  { %vm151_vm4 = vcmask 7168   ;;  %vm80_vm5 = vcmask 0   ;;  %v253_v46 = vmov 0.0   ;;  %s254_s17 = smov [#allocation3]  }
   0x5   :  { %v112_v15 = vand.u32 127, %v111_v10  ;;  %v141_v30 = vshrl.u32 %v111_v10, 7  ;;  %81 = vst.msk [vmem:[#allocation2] sm:$0x1] %vm80_vm5, %v253_v46 }
   0x7   :  { %88 = vmax.xlane.f32.xlu0 %v87_v5  ;;  %114 = vperm.xlu1 %231, %v84_v6   ;;  %v142_v33 = vadd.s32 8, %v141_v30 }
   0x9   :  { %vm148_vm3 = vcmp.lt.s32.totalorder %v142_v33, 13 }
   0xc   :  { %v146_v54 = vld [vmem:[#allocation2] sm:$0x1] }
  0x7e   :  { %v118_v13 = vpop.permute.xlu1 %117 }
  0x7f   :  { %vm120_vm1 = vcmp.eq.s32.totalorder %v112_v15, %v118_v13 }
  0x80   :  { %v122_v18 = vsel %vm120_vm1, 0.9025, %v252_v17 }
  0x81   :  { %v124_v19 = vmul.f32 %v122_v18, %v83_v0 }
  0x82   :  { %v115_v16 = vpop.permute.xlu1 %114 }
  0x83   :  { %vm119_vm2 = vcmp.eq.s32.totalorder %v112_v15, %v115_v16  ;;  %v128_v23 = vsel %vm86_vm0, %v124_v19, 0.0 }
  0x84   :  { %v121_v21 = vsel %vm119_vm2, 0.9025, %v252_v17 }
  0x85   :  { %v123_v24 = vmul.f32 %v121_v21, %v82_v1 }
  0x87   :  { %v125_v27 = vsel %vm86_vm0, %v123_v24, 0.0 }
  0x8c   :  { %v92_v7 = vpop.xlane.xlu0 %91 }
  0x8d   :  { %v94_v8 = vsub.f32 %v83_v0, %v92_v7 }
  0x8f   :  { %v97_v9 = vmul.f32 1.442695, %v94_v8 }
  0x90   :  { %v89_v11 = vpop.xlane.xlu0 %88 }
  0x91   :  { %233 = vpow2.f32 %v97_v9  ;;  %v93_v12 = vsub.f32 %v82_v1, %v89_v11 }
  0x93   :  { %v95_v14 = vmul.f32 1.442695, %v93_v12 }
  0x95   :  { %235 = vpow2.f32 %v95_v14 }
  0x9e   :  { %v234_v20 = vpop.eup %233 }
  0x9f   :  { %v102_v22 = vsel %vm86_vm0, %v234_v20, 0.0 }
  0xa0   :  { %103 = vadd.xlane.f32.xlu0 %v102_v22 }
  0xa2   :  { %v236_v25 = vpop.eup %235 }
  0xa3   :  { %v99_v26 = vsel %vm86_vm0, %v236_v25, 0.0 }
  0xa4   :  { %100 = vadd.xlane.f32.xlu1 %v99_v26  ;;  %129 = vadd.xlane.f32.xlu0 %v128_v23 }
  0xa8   :  { %126 = vadd.xlane.f32.xlu0 %v125_v27 }
 0x129   :  { %v104_v28 = vpop.xlane.xlu0 %103 }
 0x12a   :  { %237 = vlog2.f32 %v104_v28 }
 0x12d   :  { %v101_v29 = vpop.xlane.xlu1 %100  ;;  %v130_v34 = vpop.xlane.xlu0 %129 }
 0x12e   :  { %239 = vlog2.f32 %v101_v29 }
 0x131   :  { %v127_v41 = vpop.xlane.xlu0 %126 }
 0x137   :  { %v238_v31 = vpop.eup %237 }
 0x138   :  { %v108_v32 = vmul.f32 0.6931472, %v238_v31 }
 0x13a   :  { %v110_v35 = vadd.f32 %v108_v32, %v92_v7 }
 0x13b   :  { %v240_v36 = vpop.eup %239 }
 0x13c   :  { %v106_v37 = vmul.f32 0.6931472, %v240_v36  ;;  %v132_v38 = vsub.f32 %v110_v35, %v130_v34 }
 0x13e   :  { %v109_v39 = vadd.f32 %v106_v37, %v89_v11  ;;  %v150_v40 = vsel %vm148_vm3, %v132_v38, 0.0 }
 0x13f   :  { %v153_v44 = vsel %vm151_vm4, %v150_v40, 0.0 }
 0x140   :  { %v131_v42 = vsub.f32 %v109_v39, %v127_v41 }
 0x142   :  { %v152_v43 = vsel %vm151_vm4, %v131_v42, 0.0 }
 0x143   :  { %v154_v45 = vadd.f32 %v153_v44, %v152_v43 }
 0x145   :  { %155 = vadd.xlane.f32.xlu0 %v154_v45 }
 0x1ce   :  { %v156_v47 = vpop.xlane.xlu0 %155 }
 0x1cf   :  { %v157_v48 = vrot.slane %v156_v47, 4 }
 0x1d1   :  { %v158_v49 = vadd.f32 %v157_v48, %v156_v47 }
 0x1d3   :  { %v159_v50 = vrot.slane %v158_v49, 2 }
 0x1d5   :  { %v160_v51 = vadd.f32 %v159_v50, %v158_v49 }
 0x1d7   :  { %v161_v52 = vrot.slane %v160_v51, 1 }
 0x1d9   :  { %v162_v53 = vadd.f32 %v161_v52, %v160_v51 }
 0x1db   :  { %223 = vpush %v162_v53 }
 0x20c   :  { %s224_s0 = spop %223 }
 0x20d   :  { %v164_v55 = vstv %s224_s0 }
 0x20e   :  { %v165_v56 = vadd.f32 %v164_v55, %v146_v54 }
 0x210   :  { %167 = vst.msk [vmem:[#allocation2] sm:$0x1] %vm80_vm5, %v165_v56 }
 0x217   :  { %v193_v57 = vld [vmem:[#allocation2] sm:$0x1] }
 0x218   :  { %225 = vpush %v193_v57 }
 0x249   :  { %s226_s1 = spop %225 }
 0x24a   :  { %197 = sst [smem:[#allocation3]] %s226_s1 }
 0x24b   :  { %205 = dma.smem_to_hbm %s254_s17, 16, %s293_s2, [#allocation4]  }
 0x24c   :  { %249 = dma.done.wait [#allocation4], 16  }
 0x24d   :  { %250 = vsyncadd [#allocation4], 4294967280 }
 0x24e   :  { %209 = sfence }
 0x24f   :  { %210 = vsyncpa [#allocation4], 1 }

</bundles_post_ra>
